<compile_context>
chip_gen: v5e
topology: v5e:2x2
jax: 0.10.0
libtpu: 0.0.40
codegen_flags: <defaults>
</compile_context>

<pallas_src>
from functools import partial

import jax
import jax.numpy as jnp
from jax.experimental import pallas as pl
from jax.experimental.pallas import tpu as pltpu


# ----------------------------- Pallas kernel -------------------------------
def _fbcnet_kernel(x_ref, w_ref, shift_ref, seg_ref, wk_ref, blin_ref, o_ref,
                   *, stride_factor, seg_len, bt):
    # x_ref    : (1, nB*C, Bt*T)   Bt batch elements fused on the lane axis
    # w_ref    : (mB, nB*C)        block-diag grouped-conv weight, BN scale folded in
    # shift_ref: (mB, 1)           fused conv-bias + BN shift
    # seg_ref  : (Bt*T, Bt*S)      segment indicator matrix, column = s*Bt + b
    # wk_ref   : (S, ncls, mB)     head weight, wk[s, c, i] = W_lin[c, i*S + s]
    # blin_ref : (ncls, 1)
    # o_ref    : (1, ncls, Bt)     logits with batch on lanes
    x = x_ref[0]                                                   # (nB*C, Bt*T)

    # --- SCB: grouped spatial conv + BN affine (scale pre-folded) ---
    y = jnp.dot(w_ref[...], x, preferred_element_type=jnp.float32)  # (mB, Bt*T)
    y = y + shift_ref[...]

    # --- swish (EUP sigmoid + VPU multiply) ---
    y = y * jax.nn.sigmoid(y)

    # --- LogVarLayer: per-(channel, segment, batch) unbiased variance via MXU ---
    p = seg_ref[...]                                               # (Bt*T, Bt*S)
    s1 = jnp.dot(y, p, preferred_element_type=jnp.float32)         # (mB, S*Bt)
    s2 = jnp.dot(y * y, p, preferred_element_type=jnp.float32)     # (mB, S*Bt)
    inv_l = 1.0 / seg_len
    var = (s2 - s1 * s1 * inv_l) * (1.0 / (seg_len - 1.0))
    lv = jnp.log(jnp.clip(var, 1e-6, 1e6))                         # (mB, S*Bt)

    # --- linear head: accumulate S small MXU matmuls -> (ncls, Bt) ---
    acc = None
    for s in range(stride_factor):
        lv_s = lv[:, s * bt:(s + 1) * bt]                          # (mB, Bt)
        c = jnp.dot(wk_ref[s], lv_s, preferred_element_type=jnp.float32)
        acc = c if acc is None else acc + c
    logits = acc + blin_ref[...]                                   # (ncls, Bt)

    # --- LogSoftmax over classes (sublane axis) ---
    mx = jnp.max(logits, axis=0, keepdims=True)
    z = logits - mx
    lse = jnp.log(jnp.sum(jnp.exp(z), axis=0, keepdims=True))
    o_ref[0] = (z - lse).astype(o_ref.dtype)


# ------------------------------ host wrapper --------------------------------
def renorm(w, maxnorm):
    """torch.renorm(w, p=2, dim=0, maxnorm) equivalent."""
    flat = w.reshape(w.shape[0], -1)
    norms = jnp.sqrt(jnp.sum(flat * flat, axis=1, keepdims=True))
    scale = jnp.where(norms > maxnorm, maxnorm / jnp.maximum(norms, 1e-12), 1.0)
    return (flat * scale).reshape(w.shape)


def fbcnet_forward(x, params, *, m, n_bands, stride_factor, batch_tile=None):
    B, one, C, T, nB = x.shape
    assert one == 1 and nB == n_bands
    S = stride_factor
    mB = m * nB
    assert T % S == 0
    L = T // S
    n_classes = params["w_lin"].shape[0]

    Bt = B if batch_tile is None else batch_tile
    assert B % Bt == 0
    nb = B // Bt

    # --- parameter glue (plain JAX) ---
    w_conv = renorm(params["w_conv"], 2.0)          # (mB, 1, C, 1) max_norm=2
    w_lin = renorm(params["w_lin"], 0.5)            # (n_classes, F) max_norm=0.5

    Wg = w_conv.reshape(nB, m, C)
    w_bd = jax.scipy.linalg.block_diag(*[Wg[b] for b in range(nB)])  # (mB, nB*C)

    eps = 1e-5
    scale = params["bn_gamma"] / jnp.sqrt(params["bn_var"] + eps)
    shift = params["bn_beta"] + (params["b_conv"] - params["bn_mean"]) * scale
    w_scaled = (w_bd * scale[:, None]).astype(jnp.float32)           # fold BN scale
    shift = shift.reshape(mB, 1).astype(jnp.float32)

    # head weight: wk[s, c, i] = W_lin[c, i*S + s]   (feature index = i*S + s)
    wk = jnp.transpose(w_lin.reshape(n_classes, mB, S), (2, 0, 1)).astype(jnp.float32)
    blin = params["b_lin"].reshape(n_classes, 1).astype(jnp.float32)

    # segment indicator matrix: row = b*T + s*L + j  ->  column = s*Bt + b
    rows = jnp.arange(Bt * T)
    col_of_row = (rows % T) // L * Bt + rows // T
    segmat = (col_of_row[:, None] == jnp.arange(Bt * S)[None, :]).astype(jnp.float32)

    # input layout: (B,1,C,T,nB) -> (nb, nB*C, Bt*T) with batch fused on lanes
    xs = jnp.squeeze(x, axis=1).reshape(nb, Bt, C, T, nB)
    xs = jnp.transpose(xs, (0, 4, 2, 1, 3))                          # (nb,nB,C,Bt,T)
    x3 = xs.reshape(nb, nB * C, Bt * T).astype(jnp.float32)

    kernel = partial(_fbcnet_kernel, stride_factor=S, seg_len=float(L), bt=Bt)

    out = pl.pallas_call(
        kernel,
        out_shape=jax.ShapeDtypeStruct((nb, n_classes, Bt), jnp.float32),
        grid=(nb,),
        in_specs=[
            pl.BlockSpec((1, nB * C, Bt * T), lambda i: (i, 0, 0)),
            pl.BlockSpec((mB, nB * C), lambda i: (0, 0)),
            pl.BlockSpec((mB, 1), lambda i: (0, 0)),
            pl.BlockSpec((Bt * T, Bt * S), lambda i: (0, 0)),
            pl.BlockSpec((S, n_classes, mB), lambda i: (0, 0, 0)),
            pl.BlockSpec((n_classes, 1), lambda i: (0, 0)),
        ],
        out_specs=pl.BlockSpec((1, n_classes, Bt), lambda i: (i, 0, 0)),
        compiler_params=pltpu.CompilerParams(dimension_semantics=("parallel",)),
    )(x3, w_scaled, shift, segmat, wk, blin)

    # (nb, ncls, Bt) -> (B, ncls)
    return jnp.transpose(out, (0, 2, 1)).reshape(B, n_classes)


# --------------------------- pure-JAX reference -----------------------------
def ref_forward(x, params, *, m, n_bands, stride_factor):
    B, _, C, T, nB = x.shape
    mB = m * nB
    w_conv = renorm(params["w_conv"], 2.0)
    w_lin = renorm(params["w_lin"], 0.5)

    xp = jnp.squeeze(jnp.transpose(x, (0, 4, 2, 3, 1)), axis=4)       # (B,nB,C,T)
    Wg = w_conv.reshape(nB, m, C)
    y = jnp.einsum("bnct,nmc->bnmt", xp, Wg).reshape(B, mB, T)
    y = y + params["b_conv"][None, :, None]
    y = (y - params["bn_mean"][None, :, None]) / jnp.sqrt(
        params["bn_var"][None, :, None] + 1e-5)
    y = y * params["bn_gamma"][None, :, None] + params["bn_beta"][None, :, None]
    y = y * jax.nn.sigmoid(y)
    y = y.reshape(B, mB, stride_factor, T // stride_factor)
    var = jnp.var(y, axis=-1, ddof=1)                                 # unbiased
    lv = jnp.log(jnp.clip(var, 1e-6, 1e6))                            # (B,mB,S)
    feat = lv.reshape(B, mB * stride_factor)
    logits = feat @ w_lin.T + params["b_lin"]
    return jax.nn.log_softmax(logits, axis=1)


# --------------------------------- main -------------------------------------
if __name__ == "__main__":
    # Small, FBCNet-consistent shapes: batch=8, channels=8, samples=64,
    # bands=4, m=8 spatial filters, strideFactor=4, 2 classes.
    # batch_tile=4 -> grid of 2 "parallel" steps (feeds both v7x TensorCores).
    B, C, T, nB, m, S, ncls = 8, 8, 64, 4, 8, 4, 2
    mB = m * nB
    F = mB * S

    key = jax.random.PRNGKey(0)
    ks = jax.random.split(key, 10)
    x = jax.random.normal(ks[0], (B, 1, C, T, nB), jnp.float32)

    params = dict(
        w_conv=jax.random.normal(ks[1], (mB, 1, C, 1), jnp.float32) * 0.3,
        b_conv=jax.random.normal(ks[2], (mB,), jnp.float32) * 0.1,
        bn_gamma=1.0 + 0.1 * jax.random.normal(ks[3], (mB,), jnp.float32),
        bn_beta=0.1 * jax.random.normal(ks[4], (mB,), jnp.float32),
        bn_mean=0.1 * jax.random.normal(ks[5], (mB,), jnp.float32),
        bn_var=1.0 + 0.5 * jax.random.uniform(ks[6], (mB,), jnp.float32),
        w_lin=jax.random.normal(ks[7], (ncls, F), jnp.float32) * 0.1,
        b_lin=jax.random.normal(ks[8], (ncls,), jnp.float32) * 0.1,
    )

    out = fbcnet_forward(x, params, m=m, n_bands=nB, stride_factor=S,
                         batch_tile=4)
    out = jax.block_until_ready(out)

    ref = ref_forward(x, params, m=m, n_bands=nB, stride_factor=S)
    assert out.shape == (B, ncls), out.shape
    assert jnp.allclose(out, ref, atol=1e-4, rtol=1e-4), (out, ref)

    print("KERNEL_OK")
</pallas_src>

<mosaic_0001>
module attributes {stable_mosaic.version = 11 : i64} {
  func.func @_fbcnet_kernel(%arg0: i32, %arg1: memref<1x32x256xf32, #tpu.memory_space<vmem>>, %arg2: memref<32x32xf32, #tpu.memory_space<vmem>>, %arg3: memref<32x1xf32, #tpu.memory_space<vmem>>, %arg4: memref<256x16xf32, #tpu.memory_space<vmem>>, %arg5: memref<4x2x32xf32, #tpu.memory_space<vmem>>, %arg6: memref<2x1xf32, #tpu.memory_space<vmem>>, %arg7: memref<1x2x4xf32, #tpu.memory_space<vmem>>) attributes {dimension_semantics = [#tpu.dimension_semantics<parallel>], iteration_bounds = array<i64: 2>, scalar_prefetch = 0 : i64, scratch_operands = 0 : i64, tpu.core_type = #tpu.core_type<tc>, window_params = [{transform_indices = @transform_0, window_bounds = array<i64: 1, 32, 256>}, {pipeline_mode = #tpu.pipeline_mode<synchronous>, transform_indices = @transform_1, window_bounds = array<i64: 32, 32>}, {pipeline_mode = #tpu.pipeline_mode<synchronous>, transform_indices = @transform_2, window_bounds = array<i64: 32, 1>}, {pipeline_mode = #tpu.pipeline_mode<synchronous>, transform_indices = @transform_3, window_bounds = array<i64: 256, 16>}, {pipeline_mode = #tpu.pipeline_mode<synchronous>, transform_indices = @transform_4, window_bounds = array<i64: 4, 2, 32>}, {pipeline_mode = #tpu.pipeline_mode<synchronous>, transform_indices = @transform_5, window_bounds = array<i64: 2, 1>}, {transform_indices = @transform_6, window_bounds = array<i64: 1, 2, 4>}]} {
    %c0 = arith.constant 0 : index
    %c0_0 = arith.constant 0 : index
    %c0_1 = arith.constant 0 : index
    %0 = vector.load %arg1[%c0, %c0_0, %c0_1] : memref<1x32x256xf32, #tpu.memory_space<vmem>>, vector<1x32x256xf32>
    %1 = vector.shape_cast %0 : vector<1x32x256xf32> to vector<32x256xf32>
    %c0_2 = arith.constant 0 : index
    %c0_3 = arith.constant 0 : index
    %2 = vector.load %arg2[%c0_2, %c0_3] : memref<32x32xf32, #tpu.memory_space<vmem>>, vector<32x32xf32>
    %cst = arith.constant dense<0.000000e+00> : vector<32x256xf32>
    %3 = tpu.matmul %2, %1, %cst {dimension_numbers = #tpu.dot_dimension_numbers<[1], [0], [0], [1], [0, 0, 1, 1], [], []>} : vector<32x32xf32>, vector<32x256xf32>, vector<32x256xf32> -> vector<32x256xf32>
    %c0_4 = arith.constant 0 : index
    %c0_5 = arith.constant 0 : index
    %4 = vector.load %arg3[%c0_4, %c0_5] : memref<32x1xf32, #tpu.memory_space<vmem>>, vector<32x1xf32>
    %5 = vector.broadcast %4 : vector<32x1xf32> to vector<32x256xf32>
    %6 = arith.addf %3, %5 : vector<32x256xf32>
    %7 = arith.negf %6 : vector<32x256xf32>
    %8 = math.exp %7 : vector<32x256xf32>
    %cst_6 = arith.constant 1.000000e+00 : f32
    %9 = vector.broadcast %cst_6 : f32 to vector<32x256xf32>
    %10 = arith.addf %9, %8 : vector<32x256xf32>
    %11 = arith.divf %9, %10 : vector<32x256xf32>
    %12 = arith.mulf %6, %11 : vector<32x256xf32>
    %c0_7 = arith.constant 0 : index
    %c0_8 = arith.constant 0 : index
    %13 = vector.load %arg4[%c0_7, %c0_8] : memref<256x16xf32, #tpu.memory_space<vmem>>, vector<256x16xf32>
    %cst_9 = arith.constant dense<0.000000e+00> : vector<32x16xf32>
    %14 = tpu.matmul %12, %13, %cst_9 {dimension_numbers = #tpu.dot_dimension_numbers<[1], [0], [0], [1], [0, 0, 1, 1], [], []>} : vector<32x256xf32>, vector<256x16xf32>, vector<32x16xf32> -> vector<32x16xf32>
    %15 = arith.mulf %12, %12 : vector<32x256xf32>
    %cst_10 = arith.constant dense<0.000000e+00> : vector<32x16xf32>
    %16 = tpu.matmul %15, %13, %cst_10 {dimension_numbers = #tpu.dot_dimension_numbers<[1], [0], [0], [1], [0, 0, 1, 1], [], []>} : vector<32x256xf32>, vector<256x16xf32>, vector<32x16xf32> -> vector<32x16xf32>
    %17 = arith.mulf %14, %14 : vector<32x16xf32>
    %cst_11 = arith.constant 6.250000e-02 : f32
    %18 = vector.broadcast %cst_11 : f32 to vector<32x16xf32>
    %19 = arith.mulf %17, %18 : vector<32x16xf32>
    %20 = arith.subf %16, %19 : vector<32x16xf32>
    %cst_12 = arith.constant 0.0666666701 : f32
    %21 = vector.broadcast %cst_12 : f32 to vector<32x16xf32>
    %22 = arith.mulf %20, %21 : vector<32x16xf32>
    %cst_13 = arith.constant 9.99999997E-7 : f32
    %cst_14 = arith.constant 1.000000e+06 : f32
    %23 = vector.broadcast %cst_13 : f32 to vector<32x16xf32>
    %24 = arith.maximumf %23, %22 : vector<32x16xf32>
    %25 = vector.broadcast %cst_14 : f32 to vector<32x16xf32>
    %26 = arith.minimumf %25, %24 : vector<32x16xf32>
    %27 = math.log %26 : vector<32x16xf32>
    %28 = vector.extract_strided_slice %27 {offsets = [0, 0], sizes = [32, 4], strides = [1, 1]} : vector<32x16xf32> to vector<32x4xf32>
    %c0_15 = arith.constant 0 : index
    %c0_16 = arith.constant 0 : index
    %c0_17 = arith.constant 0 : index
    %29 = vector.load %arg5[%c0_15, %c0_16, %c0_17] : memref<4x2x32xf32, #tpu.memory_space<vmem>>, vector<1x2x32xf32>
    %30 = vector.shape_cast %29 : vector<1x2x32xf32> to vector<2x32xf32>
    %cst_18 = arith.constant dense<0.000000e+00> : vector<2x4xf32>
    %31 = tpu.matmul %30, %28, %cst_18 {dimension_numbers = #tpu.dot_dimension_numbers<[1], [0], [0], [1], [0, 0, 1, 1], [], []>} : vector<2x32xf32>, vector<32x4xf32>, vector<2x4xf32> -> vector<2x4xf32>
    %32 = vector.extract_strided_slice %27 {offsets = [0, 4], sizes = [32, 4], strides = [1, 1]} : vector<32x16xf32> to vector<32x4xf32>
    %c1 = arith.constant 1 : index
    %c0_19 = arith.constant 0 : index
    %c0_20 = arith.constant 0 : index
    %33 = vector.load %arg5[%c1, %c0_19, %c0_20] : memref<4x2x32xf32, #tpu.memory_space<vmem>>, vector<1x2x32xf32>
    %34 = vector.shape_cast %33 : vector<1x2x32xf32> to vector<2x32xf32>
    %cst_21 = arith.constant dense<0.000000e+00> : vector<2x4xf32>
    %35 = tpu.matmul %34, %32, %cst_21 {dimension_numbers = #tpu.dot_dimension_numbers<[1], [0], [0], [1], [0, 0, 1, 1], [], []>} : vector<2x32xf32>, vector<32x4xf32>, vector<2x4xf32> -> vector<2x4xf32>
    %36 = arith.addf %31, %35 : vector<2x4xf32>
    %37 = vector.extract_strided_slice %27 {offsets = [0, 8], sizes = [32, 4], strides = [1, 1]} : vector<32x16xf32> to vector<32x4xf32>
    %c2 = arith.constant 2 : index
    %c0_22 = arith.constant 0 : index
    %c0_23 = arith.constant 0 : index
    %38 = vector.load %arg5[%c2, %c0_22, %c0_23] : memref<4x2x32xf32, #tpu.memory_space<vmem>>, vector<1x2x32xf32>
    %39 = vector.shape_cast %38 : vector<1x2x32xf32> to vector<2x32xf32>
    %cst_24 = arith.constant dense<0.000000e+00> : vector<2x4xf32>
    %40 = tpu.matmul %39, %37, %cst_24 {dimension_numbers = #tpu.dot_dimension_numbers<[1], [0], [0], [1], [0, 0, 1, 1], [], []>} : vector<2x32xf32>, vector<32x4xf32>, vector<2x4xf32> -> vector<2x4xf32>
    %41 = arith.addf %36, %40 : vector<2x4xf32>
    %42 = vector.extract_strided_slice %27 {offsets = [0, 12], sizes = [32, 4], strides = [1, 1]} : vector<32x16xf32> to vector<32x4xf32>
    %c3 = arith.constant 3 : index
    %c0_25 = arith.constant 0 : index
    %c0_26 = arith.constant 0 : index
    %43 = vector.load %arg5[%c3, %c0_25, %c0_26] : memref<4x2x32xf32, #tpu.memory_space<vmem>>, vector<1x2x32xf32>
    %44 = vector.shape_cast %43 : vector<1x2x32xf32> to vector<2x32xf32>
    %cst_27 = arith.constant dense<0.000000e+00> : vector<2x4xf32>
    %45 = tpu.matmul %44, %42, %cst_27 {dimension_numbers = #tpu.dot_dimension_numbers<[1], [0], [0], [1], [0, 0, 1, 1], [], []>} : vector<2x32xf32>, vector<32x4xf32>, vector<2x4xf32> -> vector<2x4xf32>
    %46 = arith.addf %41, %45 : vector<2x4xf32>
    %c0_28 = arith.constant 0 : index
    %c0_29 = arith.constant 0 : index
    %47 = vector.load %arg6[%c0_28, %c0_29] : memref<2x1xf32, #tpu.memory_space<vmem>>, vector<2x1xf32>
    %48 = vector.broadcast %47 : vector<2x1xf32> to vector<2x4xf32>
    %49 = arith.addf %46, %48 : vector<2x4xf32>
    %cst_30 = arith.constant dense<0xFF800000> : vector<4xf32>
    %50 = vector.multi_reduction <maximumf>, %49, %cst_30 [0] : vector<2x4xf32> to vector<4xf32>
    %51 = vector.shape_cast %50 : vector<4xf32> to vector<1x4xf32>
    %52 = vector.broadcast %51 : vector<1x4xf32> to vector<2x4xf32>
    %53 = arith.subf %49, %52 : vector<2x4xf32>
    %54 = math.exp %53 : vector<2x4xf32>
    %cst_31 = arith.constant dense<0.000000e+00> : vector<4xf32>
    %55 = vector.multi_reduction <add>, %54, %cst_31 [0] : vector<2x4xf32> to vector<4xf32>
    %56 = vector.shape_cast %55 : vector<4xf32> to vector<1x4xf32>
    %57 = math.log %56 : vector<1x4xf32>
    %58 = vector.broadcast %57 : vector<1x4xf32> to vector<2x4xf32>
    %59 = arith.subf %53, %58 : vector<2x4xf32>
    %c0_32 = arith.constant 0 : index
    %c0_33 = arith.constant 0 : index
    %c0_34 = arith.constant 0 : index
    %60 = vector.load %arg7[%c0_32, %c0_33, %c0_34] : memref<1x2x4xf32, #tpu.memory_space<vmem>>, vector<1x2x4xf32>
    %61 = vector.shape_cast %60 : vector<1x2x4xf32> to vector<2x4xf32>
    %62 = vector.shape_cast %59 : vector<2x4xf32> to vector<1x2x4xf32>
    tpu.vector_store %arg7[%c0_32, %c0_33, %c0_34], %62 {strides = array<i32>} : memref<1x2x4xf32, #tpu.memory_space<vmem>>, vector<1x2x4xf32>,
    return
  }
  func.func @transform_0(%arg0: i32) -> (i32, i32, i32) {
    %c0_i32 = arith.constant 0 : i32
    %c0_i32_0 = arith.constant 0 : i32
    %c0_i32_1 = arith.constant 0 : i32
    return %arg0, %c0_i32, %c0_i32_0 : i32, i32, i32
  }
  func.func @transform_1(%arg0: i32) -> (i32, i32) {
    %c0_i32 = arith.constant 0 : i32
    %c0_i32_0 = arith.constant 0 : i32
    %c0_i32_1 = arith.constant 0 : i32
    return %c0_i32, %c0_i32_0 : i32, i32
  }
  func.func @transform_2(%arg0: i32) -> (i32, i32) {
    %c0_i32 = arith.constant 0 : i32
    %c0_i32_0 = arith.constant 0 : i32
    %c0_i32_1 = arith.constant 0 : i32
    return %c0_i32, %c0_i32_0 : i32, i32
  }
  func.func @transform_3(%arg0: i32) -> (i32, i32) {
    %c0_i32 = arith.constant 0 : i32
    %c0_i32_0 = arith.constant 0 : i32
    %c0_i32_1 = arith.constant 0 : i32
    return %c0_i32, %c0_i32_0 : i32, i32
  }
  func.func @transform_4(%arg0: i32) -> (i32, i32, i32) {
    %c0_i32 = arith.constant 0 : i32
    %c0_i32_0 = arith.constant 0 : i32
    %c0_i32_1 = arith.constant 0 : i32
    %c0_i32_2 = arith.constant 0 : i32
    return %c0_i32, %c0_i32_0, %c0_i32_1 : i32, i32, i32
  }
  func.func @transform_5(%arg0: i32) -> (i32, i32) {
    %c0_i32 = arith.constant 0 : i32
    %c0_i32_0 = arith.constant 0 : i32
    %c0_i32_1 = arith.constant 0 : i32
    return %c0_i32, %c0_i32_0 : i32, i32
  }
  func.func @transform_6(%arg0: i32) -> (i32, i32, i32) {
    %c0_i32 = arith.constant 0 : i32
    %c0_i32_0 = arith.constant 0 : i32
    %c0_i32_1 = arith.constant 0 : i32
    return %arg0, %c0_i32, %c0_i32_0 : i32, i32, i32
  }
}

</mosaic_0001>

<bundles_post_ra>
// kernel: tpu_custom_call.1
= control target key start
LH: loop header
LB: loop body
LE: loop exit
PB: predicated region body
PF: predicated region fallthrough
CT: control target
= control target key end

     0   :  { %11 = vsyncpa [#allocation3], 0  ;;  %s1546_s0 = inlined_call_operand.vmem [shape: f32[2,32,256], index: 0, kind: input, shape index: {}]   ;;  %s1547_s1 = inlined_call_operand.vmem [shape: f32[32,32], index: 1, kind: input, shape index: {}]   ;;  %s1548_s2 = inlined_call_operand.vmem [shape: f32[32,1], index: 2, kind: input, shape index: {}]   ;;  %s1549_s3 = inlined_call_operand.vmem [shape: f32[256,16], index: 3, kind: input, shape index: {}]   ;;  %s1550_s4 = inlined_call_operand.vmem [shape: f32[4,2,32], index: 4, kind: input, shape index: {}]   ;;  %s1551_s5 = inlined_call_operand.vmem [shape: f32[2,1], index: 5, kind: input, shape index: {}]   ;;  %s1552_s6 = inlined_call_operand.hbm [shape: f32[2,2,4], index: 6, kind: output, shape index: {}]  }
   0x1   :  { %13 = vsyncpa [#allocation3 + $0x1], 0  ;;  %s1207_s21 = smov 0   ;;  %s1209_s22 = smov 0  }
   0x2   :  { %s1211_s23 = smov 0   ;;  %s1213_s24 = smov 0  }
   0x3 LB: > { %s1228_s25 = sadd.s32 4294967295, %s1166_s24   ;;  %s950_s26 = sadd.s32 4294967294, %s1166_s24   ;;  %s1166_s24 = sphi %s1213_s24, %s1566_s24   ;;  %s1162_s23 = sphi %s1211_s23, %s1565_s23   ;;  %s1158_s22 = sphi %s1209_s22, %s1564_s22   ;;  %s1154_s21 = sphi %s1207_s21, %s1563_s21  }
   0x4   : > { %s1232_s27 = sadd.s32 1, %s1166_s24   ;;  %s157_s28 = sadd.s32 1, %s1162_s23 }
   0x5   : > { %s154_s29 = ssub.s32 %s1166_s24, %s1232_s27  ;;  %p167_p0 = scmp.ne.s32.totalorder %s1162_s23, %s1158_s22 }
   0x6   : > { %p155_p1 = scmp.eq.s32.totalorder %s154_s29, 0  ;;  %p168_p2 = scmp.eq.s32.totalorder %s1228_s25, 1 }
   0x7   : > { %p173_p3 = scmp.ne.s32.totalorder %s1158_s22, %s1154_s21  ;;  %p174_p4 = scmp.eq.s32.totalorder %s950_s26, 1 }
   0x8   : > { %s1243_s30 = scalar_select %p155_p1, %s1162_s23, %s157_s28  }
   0x9   : > { %p1245_p5 = por %p168_p2, %p167_p0  ;;  %p1249_p6 = por %p174_p4, %p173_p3 }
   0xa   : > { %p953_p7 = scmp.ge.s32.totalorder %s1166_s24, 1  ;;  %p215_p8 = scmp.lt.s32.totalorder %s1166_s24, 3 }
   0xc   : > { %p216_p9 = pnand %p953_p7, %p215_p8 }
   0xd   : > { %p245_p10 = scmp.lt.s32.totalorder (!%p216_p9), %s1228_s25, 1  ;;  %s1169_s19 = smov (!%p216_p9), 116  }
   0xe   : > { %219 = sbr.rel (%p216_p9) target bundleno = 682 (0x2aa), region = 44  ;;  %s1170_s20 = smov (!%p216_p9), 120  }
   0xf   : > { %s1171_s26 = smov (!%p216_p9), 124   ;;  %s1124_s15 = scalar_lea.hbm (!%p216_p9), %s1552_s6, 4 }
  0x13   : > { %v262_v0 = vld [vmem:[%s1548_s2] sm:$0xff]  ;;  %v1168_v1 = vmov 0   ;;  %v264_v2 = vld [vmem:[%s1548_s2 + $0x10] sm:$0xff]  ;;  %s246_s13 = scalar_select %p245_p10, %s1228_s25, 1  ;;  %v263_v7 = vld [vmem:[%s1548_s2 + $0x8] sm:$0xff]  ;;  %vm286_vm0 = vcmask 261120  }
  0x14   : > { %1028 = vset.pattern.permute.xlu0 %v1168_v1  ;;  %1029 = vset.pattern.permute.xlu1 %v1168_v1  ;;  %v265_v10 = vld [vmem:[%s1548_s2 + $0x18] sm:$0xff]  ;;  %v258_v13 = vld [vmem:[%s1547_s1] sm:$0xff]  ;;  %v259_v14 = vld [vmem:[%s1547_s1 + $0x8] sm:$0xff] }
  0x15   : > { %268 = vperm.xlu0 %1028, %v262_v0   ;;  %278 = vperm.xlu1 %1029, %v264_v2   ;;  %s984_s14 = sshll.u32 %s246_s13, 6  ;;  %v260_v15 = vld [vmem:[%s1547_s1 + $0x10] sm:$0xff]  ;;  %v261_v16 = vld [vmem:[%s1547_s1 + $0x18] sm:$0xff]  ;;  %v530_v21 = vld [vmem:[%s1549_s3 + $0x68] sm:$0xff] }
  0x16   : > { %s249_s17 = scalar_lea.vmem %s1546_s0, %s984_s14  ;;  %v532_v17 = vld [vmem:[%s1549_s3 + $0x78] sm:$0xff]  ;;  %v531_v19 = vld [vmem:[%s1549_s3 + $0x70] sm:$0xff]  ;;  %v546_v22 = vld [vmem:[%s1549_s3 + $0xe8] sm:$0xff] }
  0x17   : > { %v256_v3 = vld [vmem:[%s249_s17 + $0x30] sm:$0xff]  ;;  %v257_v4 = vld [vmem:[%s249_s17 + $0x38] sm:$0xff]  ;;  %v254_v5 = vld [vmem:[%s249_s17 + $0x20] sm:$0xff]  ;;  %549 = vmatpush.msra.mxu2 %v532_v17 }
  0x18   : > { %311 = vmatpush.msra.mxu0 %v256_v3  ;;  %340 = vmatpush.msra.mxu1 %v257_v4  ;;  %v255_v6 = vld [vmem:[%s249_s17 + $0x28] sm:$0xff]  ;;  %v252_v8 = vld [vmem:[%s249_s17 + $0x10] sm:$0xff]  ;;  %v253_v9 = vld [vmem:[%s249_s17 + $0x18] sm:$0xff] }
  0x19   : > { %v250_v11 = vld [vmem:[%s249_s17] sm:$0xff]  ;;  %v251_v12 = vld [vmem:[%s249_s17 + $0x8] sm:$0xff]  ;;  %v548_v18 = vld [vmem:[%s1549_s3 + $0xf8] sm:$0xff]  ;;  %550 = vmatpush.msra.mxu2 %v531_v19  ;;  %s242_s17 = sand.u32 1, %s1158_s22  }
  0x1a   : > { %312 = vmatpush.msra.mxu0 %v254_v5  ;;  %341 = vmatpush.msra.mxu1 %v255_v6  ;;  %v547_v20 = vld [vmem:[%s1549_s3 + $0xf0] sm:$0xff]  ;;  %v529_v23 = vld [vmem:[%s1549_s3 + $0x60] sm:$0xff]  ;;  %v528_v25 = vld [vmem:[%s1549_s3 + $0x58] sm:$0xff]  ;;  %s954_s18 = sshll.u32 %s242_s17, 1  ;;  %s876_s11 = scalar_lea.sflag [#allocation3], %s242_s17 }
  0x1b   : > { %578 = vmatpush.msra.mxu3 %v548_v18  ;;  %551 = vmatpush.msra.mxu2 %v530_v21  ;;  %v545_v24 = vld [vmem:[%s1549_s3 + $0xe0] sm:$0xff]  ;;  %v544_v26 = vld [vmem:[%s1549_s3 + $0xd8] sm:$0xff]  ;;  %v527_v27 = vld [vmem:[%s1549_s3 + $0x50] sm:$0xff]  ;;  %s244_s29 = scalar_lea.vmem [#allocation2], %s954_s18 }
  0x1c   : > { %313 = vmatpush.msra.mxu0 %v252_v8  ;;  %342 = vmatpush.msra.mxu1 %v253_v9  ;;  %v543_v28 = vld [vmem:[%s1549_s3 + $0xd0] sm:$0xff]  ;;  %v526_v29 = vld [vmem:[%s1549_s3 + $0x48] sm:$0xff]  ;;  %v525_v31 = vld [vmem:[%s1549_s3 + $0x40] sm:$0xff]  ;;  %s888_s9 = sshll.u32 %s244_s29, 4  ;;  %s889_s9 = int_to_ptr.vmem [resolvable:$true] %s888_s9 }
  0x1d   : > { %273 = vperm.xlu0 %1028, %v263_v7   ;;  %283 = vperm.xlu1 %1029, %v265_v10   ;;  %v542_v30 = vld [vmem:[%s1549_s3 + $0xc8] sm:$0xff]  ;;  %v541_v32 = vld [vmem:[%s1549_s3 + $0xc0] sm:$0xff]  ;;  %v524_v33 = vld [vmem:[%s1549_s3 + $0x38] sm:$0xff] }
  0x1e   : > { %314 = vmatpush.msra.mxu0 %v250_v11  ;;  %343 = vmatpush.msra.mxu1 %v251_v12  ;;  %v540_v34 = vld [vmem:[%s1549_s3 + $0xb8] sm:$0xff]  ;;  %v523_v35 = vld [vmem:[%s1549_s3 + $0x30] sm:$0xff]  ;;  %v522_v37 = vld [vmem:[%s1549_s3 + $0x28] sm:$0xff] }
  0x1f   : > { %957 = vmatmul.msk.f32.vlgmr.msra.gmra.mxu0 %vm286_vm0, %v258_v13  ;;  %961 = vmatmul.msk.f32.vlgmr.msra.gmra.mxu1 %vm286_vm0, %v258_v13  ;;  %v539_v36 = vld [vmem:[%s1549_s3 + $0xb0] sm:$0xff]  ;;  %v538_v38 = vld [vmem:[%s1549_s3 + $0xa8] sm:$0xff]  ;;  %v521_v39 = vld [vmem:[%s1549_s3 + $0x20] sm:$0xff] }
  0x20   : > { %615 = vmatpush.msrb.mxu0 %v532_v17  ;;  %644 = vmatpush.msrb.mxu1 %v548_v18  ;;  %v537_v40 = vld [vmem:[%s1549_s3 + $0xa0] sm:$0xff]  ;;  %v520_v41 = vld [vmem:[%s1549_s3 + $0x18] sm:$0xff]  ;;  %v519_v44 = vld [vmem:[%s1549_s3 + $0x10] sm:$0xff] }
  0x21   : > { %579 = vmatpush.msra.mxu3 %v547_v20  ;;  %552 = vmatpush.msra.mxu2 %v529_v23  ;;  %v536_v42 = vld [vmem:[%s1549_s3 + $0x98] sm:$0xff]  ;;  %v535_v45 = vld [vmem:[%s1549_s3 + $0x90] sm:$0xff]  ;;  %v518_v48 = vld [vmem:[%s1549_s3 + $0x8] sm:$0xff] }
  0x22   : > { %616 = vmatpush.msrb.mxu0 %v531_v19  ;;  %645 = vmatpush.msrb.mxu1 %v547_v20  ;;  %v534_v49 = vld [vmem:[%s1549_s3 + $0x88] sm:$0xff]  ;;  %v517_v52 = vld [vmem:[%s1549_s3] sm:$0xff] }
  0x23   : > { %580 = vmatpush.msra.mxu3 %v546_v22  ;;  %553 = vmatpush.msra.mxu2 %v528_v25  ;;  %v533_v53 = vld [vmem:[%s1549_s3 + $0x80] sm:$0xff] }
  0x24   : > { %617 = vmatpush.msrb.mxu0 %v530_v21  ;;  %646 = vmatpush.msrb.mxu1 %v546_v22 }
  0x25   : > { %581 = vmatpush.msra.mxu3 %v545_v24  ;;  %554 = vmatpush.msra.mxu2 %v527_v27 }
  0x26   : > { %618 = vmatpush.msrb.mxu0 %v529_v23  ;;  %647 = vmatpush.msrb.mxu1 %v545_v24 }
  0x27   : > { %958 = vmatmul.msk.f32.gmra.mxu0 %vm286_vm0, %v259_v14  ;;  %962 = vmatmul.msk.f32.gmra.mxu1 %vm286_vm0, %v259_v14 }
  0x28   : > { %582 = vmatpush.msra.mxu3 %v544_v26  ;;  %619 = vmatpush.msrb.mxu0 %v528_v25 }
  0x29   : > { %648 = vmatpush.msrb.mxu1 %v544_v26  ;;  %555 = vmatpush.msra.mxu2 %v526_v29 }
  0x2a   : > { %583 = vmatpush.msra.mxu3 %v543_v28  ;;  %620 = vmatpush.msrb.mxu0 %v527_v27 }
  0x2b   : > { %649 = vmatpush.msrb.mxu1 %v543_v28  ;;  %556 = vmatpush.msra.mxu2 %v525_v31 }
  0x2c   : > { %584 = vmatpush.msra.mxu3 %v542_v30  ;;  %621 = vmatpush.msrb.mxu0 %v526_v29 }
  0x2d   : > { %650 = vmatpush.msrb.mxu1 %v542_v30  ;;  %557 = vmatpush.msra.mxu2 %v524_v33 }
  0x2e   : > { %585 = vmatpush.msra.mxu3 %v541_v32  ;;  %622 = vmatpush.msrb.mxu0 %v525_v31 }
  0x2f   : > { %959 = vmatmul.msk.f32.gmra.mxu0 %vm286_vm0, %v260_v15  ;;  %963 = vmatmul.msk.f32.gmra.mxu1 %vm286_vm0, %v260_v15 }
  0x30   : > { %651 = vmatpush.msrb.mxu1 %v541_v32  ;;  %586 = vmatpush.msra.mxu3 %v540_v34 }
  0x31   : > { %623 = vmatpush.msrb.mxu0 %v524_v33  ;;  %558 = vmatpush.msra.mxu2 %v523_v35 }
  0x32   : > { %652 = vmatpush.msrb.mxu1 %v540_v34  ;;  %587 = vmatpush.msra.mxu3 %v539_v36 }
  0x33   : > { %624 = vmatpush.msrb.mxu0 %v523_v35  ;;  %559 = vmatpush.msra.mxu2 %v522_v37 }
  0x34   : > { %653 = vmatpush.msrb.mxu1 %v539_v36  ;;  %588 = vmatpush.msra.mxu3 %v538_v38 }
  0x35   : > { %625 = vmatpush.msrb.mxu0 %v522_v37  ;;  %560 = vmatpush.msra.mxu2 %v521_v39 }
  0x36   : > { %654 = vmatpush.msrb.mxu1 %v538_v38  ;;  %589 = vmatpush.msra.mxu3 %v537_v40 }
  0x37   : > { %960 = vmatmul.msk.f32.gmra.mxu0 %vm286_vm0, %v261_v16  ;;  %964 = vmatmul.msk.f32.gmra.mxu1 %vm286_vm0, %v261_v16 }
  0x38   : > { %626 = vmatpush.msrb.mxu0 %v521_v39  ;;  %655 = vmatpush.msrb.mxu1 %v537_v40 }
  0x39   : > { %561 = vmatpush.msra.mxu2 %v520_v41  ;;  %590 = vmatpush.msra.mxu3 %v536_v42 }
  0x3a   : > { %627 = vmatpush.msrb.mxu0 %v520_v41  ;;  %656 = vmatpush.msrb.mxu1 %v536_v42 }
  0x3b   : > { %562 = vmatpush.msra.mxu2 %v519_v44  ;;  %591 = vmatpush.msra.mxu3 %v535_v45 }
  0x3c   : > { %628 = vmatpush.msrb.mxu0 %v519_v44  ;;  %657 = vmatpush.msrb.mxu1 %v535_v45 }
  0x3d   : > { %563 = vmatpush.msra.mxu2 %v518_v48  ;;  %592 = vmatpush.msra.mxu3 %v534_v49 }
  0x3e   : > { %629 = vmatpush.msrb.mxu0 %v518_v48  ;;  %658 = vmatpush.msrb.mxu1 %v534_v49 }
  0x3f   : > { %564 = vmatpush.msra.mxu2 %v517_v52  ;;  %593 = vmatpush.msra.mxu3 %v533_v53 }
  0x40   : > { %630 = vmatpush.msrb.mxu0 %v517_v52  ;;  %659 = vmatpush.msrb.mxu1 %v533_v53 }
  0x87   : > { %v269_v43 = vpop.permute.xlu0 %268  ;;  %v279_v3 = vpop.permute.xlu1 %278 }
  0x8f   : > { %v274_v56 = vpop.permute.xlu0 %273  ;;  %v284_v20 = vpop.permute.xlu1 %283 }
  0x9c   : > { %v316_v46 = vpop.f32.mrf.mxu0  ;;  %v345_v47 = vpop.f32.mrf.mxu1 }
  0x9d   : > { %v1382_v50 = vadd.f32 %v316_v46, %v269_v43  ;;  %v1384_v51 = vadd.f32 %v345_v47, %v269_v43 }
  0x9f   : > { %v965_v54 = vmul.f32 -1.442695, %v1382_v50  ;;  %v966_v55 = vmul.f32 -1.442695, %v1384_v51 }
  0xa1   : > { %1060 = vpow2.f32 %v965_v54 }
  0xa2   : > { %1062 = vpow2.f32 %v966_v55 }
  0xa4   : > { %v319_v57 = vpop.f32.mrf.mxu0  ;;  %v348_v58 = vpop.f32.mrf.mxu1 }
  0xa5   : > { %v1394_v59 = vadd.f32 %v319_v57, %v274_v56  ;;  %v1396_v60 = vadd.f32 %v348_v58, %v274_v56 }
  0xa7   : > { %v1061_v61 = vpop.eup %1060  ;;  %v967_v62 = vmul.f32 -1.442695, %v1394_v59  ;;  %v968_v1 = vmul.f32 -1.442695, %v1396_v60 }
  0xa8   : > { %v1063_v63 = vpop.eup %1062  ;;  %v381_v0 = vadd.f32 1.0, %v1061_v61 }
  0xa9   : > { %v382_v2 = vadd.f32 1.0, %v1063_v63  ;;  %1064 = vpow2.f32 %v967_v62 }
  0xaa   : > { %1066 = vrcp.f32 %v381_v0  ;;  %vm394_vm1 = vweird.f32 %v381_v0  ;;  %v398_v16 = vand.u32 2147483647, %v381_v0  ;;  %v400_v17 = vand.u32 2147483648, %v381_v0 }
  0xab   : > { %1068 = vrcp.f32 %v382_v2  ;;  %v413_v22 = vand.u32 2147483647, %v382_v2  ;;  %vm409_vm3 = vweird.f32 %v382_v2  ;;  %v415_v26 = vand.u32 2147483648, %v382_v2 }
  0xac   : > { %1070 = vpow2.f32 %v968_v1  ;;  %v322_v4 = vpop.f32.mrf.mxu0  ;;  %v351_v5 = vpop.f32.mrf.mxu1  ;;  %vm1416_vm4 = vcmp.eq.f32.partialorder %v398_v16, 8.507059e+37  ;;  %v401_v31 = vor.u32 1.1754944e-38, %v400_v17 }
  0xad   : > { %v1400_v6 = vadd.f32 %v322_v4, %v279_v3  ;;  %v1402_v7 = vadd.f32 %v351_v5, %v279_v3  ;;  %vm1422_vm6 = vcmp.eq.f32.partialorder %v413_v22, 8.507059e+37  ;;  %v416_v41 = vor.u32 1.1754944e-38, %v415_v26 }
  0xaf   : > { %v1065_v8 = vpop.eup %1064  ;;  %v969_v9 = vmul.f32 -1.442695, %v1400_v6  ;;  %v970_v10 = vmul.f32 -1.442695, %v1402_v7 }
  0xb0   : > { %v1067_v11 = vpop.eup %1066  ;;  %v1406_v12 = vadd.f32 1.0, %v1065_v8 }
  0xb1   : > { %v1069_v13 = vpop.eup %1068  ;;  %1072 = vpow2.f32 %v969_v9  ;;  %v390_v14 = vmul.f32 %v1067_v11, %v381_v0  ;;  %vm395_vm2 = vweird.f32 %v1067_v11 }
  0xb2   : > { %v1071_v15 = vpop.eup %1070  ;;  %1074 = vrcp.f32 %v1406_v12  ;;  %v405_v18 = vmul.f32 %v1069_v13, %v382_v2  ;;  %vm410_vm5 = vweird.f32 %v1069_v13  ;;  %vm396_vm7 = vmor %vm394_vm1, %vm395_vm2  ;;  %v428_v42 = vand.u32 2147483647, %v1406_v12 }
  0xb3   : > { %v1409_v19 = vadd.f32 1.0, %v1071_v15  ;;  %1076 = vpow2.f32 %v970_v10  ;;  %v391_v21 = vsub.f32 1.0, %v390_v14  ;;  %vm411_vm8 = vmor %vm409_vm3, %vm410_vm5  ;;  %v430_v46 = vand.u32 2147483648, %v1406_v12 }
  0xb4   : > { %v325_v23 = vpop.f32.mrf.mxu0  ;;  %v354_v24 = vpop.f32.mrf.mxu1  ;;  %v406_v25 = vsub.f32 1.0, %v405_v18  ;;  %vm424_vm10 = vweird.f32 %v1406_v12  ;;  %vm1449_vm11 = vcmp.eq.f32.partialorder %v428_v42, 8.507059e+37 }
  0xb5   : > { %1078 = vrcp.f32 %v1409_v19  ;;  %v1412_v27 = vadd.f32 %v325_v23, %v284_v20  ;;  %v1414_v28 = vadd.f32 %v354_v24, %v284_v20  ;;  %v392_v29 = vmul.f32 %v1067_v11, %v391_v21 }
  0xb6   : > { %v407_v32 = vmul.f32 %v1069_v13, %v406_v25  ;;  %v443_v58 = vand.u32 2147483647, %v1409_v19  ;;  %v445_v63 = vand.u32 2147483648, %v1409_v19  ;;  %v431_v3 = vor.u32 1.1754944e-38, %v430_v46 }
  0xb7   : > { %v1073_v33 = vpop.eup %1072  ;;  %v971_v34 = vmul.f32 -1.442695, %v1412_v27  ;;  %v972_v35 = vmul.f32 -1.442695, %v1414_v28  ;;  %v393_v36 = vadd.f32 %v1067_v11, %v392_v29  ;;  %vm439_vm13 = vweird.f32 %v1409_v19 }
  0xb8   : > { %v1075_v38 = vpop.eup %1074  ;;  %v1426_v39 = vadd.f32 1.0, %v1073_v33  ;;  %v408_v40 = vadd.f32 %v1069_v13, %v407_v32  ;;  %vm1456_vm15 = vcmp.eq.f32.partialorder %v443_v58, 8.507059e+37 }
  0xb9   : > { %v1077_v43 = vpop.eup %1076  ;;  %1080 = vpow2.f32 %v971_v34  ;;  %v397_v44 = vsel %vm396_vm7, %v1067_v11, %v393_v36  ;;  %v420_v45 = vmul.f32 %v1075_v38, %v1406_v12  ;;  %vm425_vm9 = vweird.f32 %v1075_v38 }
  0xba   : > { %1082 = vrcp.f32 %v1426_v39  ;;  %v1436_v47 = vadd.f32 1.0, %v1077_v43  ;;  %v402_v48 = vsel %vm1416_vm4, %v401_v31, %v397_v44  ;;  %v412_v49 = vsel %vm411_vm8, %v1069_v13, %v408_v40  ;;  %vm426_vm12 = vmor %vm424_vm10, %vm425_vm9 }
  0xbb   : > { %v1079_v52 = vpop.eup %1078  ;;  %1084 = vpow2.f32 %v972_v35  ;;  %v509_v53 = vmul.f32 %v402_v48, %v1382_v50  ;;  %v417_v54 = vsel %vm1422_vm6, %v416_v41, %v412_v49  ;;  %v421_v55 = vsub.f32 1.0, %v420_v45 }
  0xbc   : > { %1086 = vrcp.f32 %v1436_v47  ;;  %v510_v56 = vmul.f32 %v417_v54, %v1384_v51  ;;  %v435_v57 = vmul.f32 %v1079_v52, %v1409_v19  ;;  %vm440_vm14 = vweird.f32 %v1079_v52 }
  0xbd   : > { %565 = vmatmul.f32.vlgmr.msra.gmra.mxu2 %v509_v53  ;;  %v607_v61 = vmul.f32 %v509_v53, %v509_v53  ;;  %v422_v62 = vmul.f32 %v1075_v38, %v421_v55  ;;  %v446_v12 = vor.u32 1.1754944e-38, %v445_v63  ;;  %vm441_vm1 = vmor %vm439_vm13, %vm440_vm14  ;;  %v458_v20 = vand.u32 2147483647, %v1426_v39 }
  0xbe   : > { %594 = vmatmul.f32.vlgmr.msra.gmra.mxu3 %v510_v56  ;;  %v608_v50 = vmul.f32 %v510_v56, %v510_v56  ;;  %v436_v0 = vsub.f32 1.0, %v435_v57  ;;  %v460_v23 = vand.u32 2147483648, %v1426_v39  ;;  %v473_v30 = vand.u32 2147483647, %v1436_v47 }
  0xbf   : > { %v1081_v1 = vpop.eup %1080  ;;  %631 = vmatmul.f32.vlgmr.msrb.gmra.mxu0 %v607_v61  ;;  %v423_v2 = vadd.f32 %v1075_v38, %v422_v62  ;;  %v475_v31 = vand.u32 2147483648, %v1436_v47  ;;  %vm454_vm3 = vweird.f32 %v1426_v39  ;;  %vm469_vm6 = vweird.f32 %v1436_v47 }
  0xc0   : > { %v1083_v4 = vpop.eup %1082  ;;  %v1453_v5 = vadd.f32 1.0, %v1081_v1  ;;  %660 = vmatmul.f32.vlgmr.msrb.gmra.mxu1 %v608_v50  ;;  %v437_v8 = vmul.f32 %v1079_v52, %v436_v0  ;;  %v461_v36 = vor.u32 1.1754944e-38, %v460_v23  ;;  %vm459_vm7 = vcmp.eq.f32.partialorder %v458_v20, 8.507059e+37 }
  0xc1   : > { %v1085_v9 = vpop.eup %1084  ;;  %v427_v10 = vsel %vm426_vm12, %v1075_v38, %v423_v2  ;;  %v450_v13 = vmul.f32 %v1083_v4, %v1426_v39  ;;  %vm455_vm2 = vweird.f32 %v1083_v4  ;;  %vm474_vm9 = vcmp.eq.f32.partialorder %v473_v30, 8.507059e+37 }
  0xc2   : > { %v1087_v14 = vpop.eup %1086  ;;  %1088 = vrcp.f32 %v1453_v5  ;;  %v1462_v15 = vadd.f32 1.0, %v1085_v9  ;;  %v432_v16 = vsel %vm1449_vm11, %v431_v3, %v427_v10  ;;  %v438_v17 = vadd.f32 %v1079_v52, %v437_v8  ;;  %vm456_vm5 = vmor %vm454_vm3, %vm455_vm2 }
  0xc3   : > { %v511_v18 = vmul.f32 %v432_v16, %v1394_v59  ;;  %v451_v19 = vsub.f32 1.0, %v450_v13  ;;  %v465_v21 = vmul.f32 %v1087_v14, %v1436_v47  ;;  %vm470_vm4 = vweird.f32 %v1087_v14 }
  0xc4   : > { %1090 = vrcp.f32 %v1462_v15  ;;  %v442_v22 = vsel %vm441_vm1, %v1079_v52, %v438_v17  ;;  %vm471_vm8 = vmor %vm469_vm6, %vm470_vm4  ;;  %v476_v39 = vor.u32 1.1754944e-38, %v475_v31  ;;  %v488_v47 = vand.u32 2147483647, %v1453_v5 }
  0xc5   : > { %568 = vmatmul.f32.gmra.mxu2 %v511_v18  ;;  %v447_v24 = vsel %vm1456_vm15, %v446_v12, %v442_v22  ;;  %v609_v25 = vmul.f32 %v511_v18, %v511_v18  ;;  %v452_v26 = vmul.f32 %v1083_v4, %v451_v19  ;;  %v466_v29 = vsub.f32 1.0, %v465_v21 }
  0xc6   : > { %v512_v59 = vmul.f32 %v447_v24, %v1396_v60  ;;  %v490_v48 = vand.u32 2147483648, %v1453_v5  ;;  %vm484_vm11 = vweird.f32 %v1453_v5  ;;  %v505_v55 = vand.u32 2147483648, %v1462_v15 }
  0xc7   : > { %634 = vmatmul.f32.gmra.mxu0 %v609_v25  ;;  %v453_v32 = vadd.f32 %v1083_v4, %v452_v26  ;;  %v467_v33 = vmul.f32 %v1087_v14, %v466_v29  ;;  %vm489_vm14 = vcmp.eq.f32.partialorder %v488_v47, 8.507059e+37  ;;  %vm499_vm15 = vweird.f32 %v1462_v15 }
  0xc8   : > { %v1089_v34 = vpop.eup %1088  ;;  %597 = vmatmul.f32.gmra.mxu3 %v512_v59  ;;  %v610_v35 = vmul.f32 %v512_v59, %v512_v59  ;;  %v491_v61 = vor.u32 1.1754944e-38, %v490_v48  ;;  %v506_v50 = vor.u32 1.1754944e-38, %v505_v55  ;;  %vm853_vm3 = vcmask 25600  }
  0xc9   : > { %v457_v37 = vsel %vm456_vm5, %v1083_v4, %v453_v32  ;;  %v468_v60 = vadd.f32 %v1087_v14, %v467_v33  ;;  %v480_v38 = vmul.f32 %v1089_v34, %v1453_v5  ;;  %vm485_vm10 = vweird.f32 %v1089_v34 }
  0xca   : > { %v1091_v40 = vpop.eup %1090  ;;  %663 = vmatmul.f32.gmra.mxu1 %v610_v35  ;;  %v462_v41 = vsel %vm459_vm7, %v461_v36, %v457_v37  ;;  %vm486_vm13 = vmor %vm484_vm11, %vm485_vm10 }
  0xcb   : > { %v513_v42 = vmul.f32 %v462_v41, %v1400_v6  ;;  %v472_v43 = vsel %vm471_vm8, %v1087_v14, %v468_v60  ;;  %v481_v44 = vsub.f32 1.0, %v480_v38  ;;  %v495_v45 = vmul.f32 %v1091_v40, %v1462_v15 }
  0xcc   : > { %v477_v46 = vsel %vm474_vm9, %v476_v39, %v472_v43  ;;  %v503_v6 = vand.u32 2147483647, %v1462_v15  ;;  %vm500_vm12 = vweird.f32 %v1091_v40 }
  0xcd   : > { %571 = vmatmul.f32.gmra.mxu2 %v513_v42  ;;  %v514_v49 = vmul.f32 %v477_v46, %v1402_v7  ;;  %v611_v52 = vmul.f32 %v513_v42, %v513_v42  ;;  %v482_v53 = vmul.f32 %v1089_v34, %v481_v44  ;;  %v496_v54 = vsub.f32 1.0, %v495_v45  ;;  %vm501_vm1 = vmor %vm499_vm15, %vm500_vm12 }
  0xce   : > { %vm504_vm2 = vcmp.eq.f32.partialorder %v503_v6, 8.507059e+37 }
  0xcf   : > { %637 = vmatmul.f32.gmra.mxu0 %v611_v52  ;;  %v612_v56 = vmul.f32 %v514_v49, %v514_v49  ;;  %v483_v57 = vadd.f32 %v1089_v34, %v482_v53  ;;  %v497_v58 = vmul.f32 %v1091_v40, %v496_v54 }
  0xd0   : > { %600 = vmatmul.f32.gmra.mxu3 %v514_v49 }
  0xd1   : > { %v487_v62 = vsel %vm486_vm13, %v1089_v34, %v483_v57  ;;  %v498_v7 = vadd.f32 %v1091_v40, %v497_v58 }
  0xd2   : > { %666 = vmatmul.f32.gmra.mxu1 %v612_v56  ;;  %v492_v63 = vsel %vm489_vm14, %v491_v61, %v487_v62 }
  0xd3   : > { %v515_v0 = vmul.f32 %v492_v63, %v1412_v27  ;;  %v502_v1 = vsel %vm501_vm1, %v1091_v40, %v498_v7 }
  0xd4   : > { %v507_v2 = vsel %vm504_vm2, %v506_v50, %v502_v1  ;;  %v846_v50 = vld [vmem:[%s1551_s5] sm:$0x3] }
  0xd5   : > { %574 = vmatmul.f32.gmra.mxu2 %v515_v0  ;;  %v516_v51 = vmul.f32 %v507_v2, %v1414_v28  ;;  %v613_v3 = vmul.f32 %v515_v0, %v515_v0  ;;  %v705_v1 = vld [vmem:[%s1550_s4] sm:$0x3] }
  0xd7   : > { %640 = vmatmul.f32.gmra.mxu0 %v613_v3  ;;  %v614_v4 = vmul.f32 %v516_v51, %v516_v51 }
  0xd8   : > { %603 = vmatmul.f32.gmra.mxu3 %v516_v51 }
  0xda   : > { %669 = vmatmul.f32.gmra.mxu1 %v614_v4 }
 0x13c   : > { %v632_v5 = vpop.f32.mrf.mxu0 }
 0x13d   : > { %v661_v8 = vpop.f32.mrf.mxu1 }
 0x13e   : > { %v662_v34 = vadd.f32 %v661_v8, %v632_v5 }
 0x140   : > { %v566_v9 = vpop.f32.mrf.mxu2 }
 0x141   : > { %v595_v10 = vpop.f32.mrf.mxu3 }
 0x142   : > { %v596_v17 = vadd.f32 %v595_v10, %v566_v9  ;;  %v973_v9 = vld [vmem:[%s1550_s4 + $0x2] sm:$0x3] }
 0x144   : > { %v635_v11 = vpop.f32.mrf.mxu0  ;;  %v673_v22 = vmul.f32 %v596_v17, %v596_v17 }
 0x146   : > { %v677_v59 = vmul.f32 0.0625, %v673_v22 }
 0x147   : > { %v664_v13 = vpop.f32.mrf.mxu1 }
 0x148   : > { %v569_v12 = vpop.f32.mrf.mxu2  ;;  %v665_v30 = vadd.f32 %v664_v13, %v635_v11  ;;  %v681_v38 = vsub.f32 %v662_v34, %v677_v59 }
 0x14a   : > { %v685_v44 = vmul.f32 0.06666667, %v681_v38 }
 0x14b   : > { %v598_v14 = vpop.f32.mrf.mxu3 }
 0x14c   : > { %v599_v15 = vadd.f32 %v598_v14, %v569_v12  ;;  %v638_v16 = vpop.f32.mrf.mxu0  ;;  %v689_v49 = vmax.f32 %v685_v44, 1e-06 }
 0x14e   : > { %v674_v20 = vmul.f32 %v599_v15, %v599_v15  ;;  %v693_v54 = vmin.f32 %v689_v49, 1000000.0 }
 0x14f   : > { %v667_v18 = vpop.f32.mrf.mxu1 }
 0x150   : > { %v572_v27 = vpop.f32.mrf.mxu2  ;;  %v668_v23 = vadd.f32 %v667_v18, %v638_v16  ;;  %v678_v25 = vmul.f32 0.0625, %v674_v20  ;;  %v976_v18 = vld [vmem:[%s1550_s4 + $0x4] sm:$0x3] }
 0x152   : > { %v682_v35 = vsub.f32 %v665_v30, %v678_v25 }
 0x153   : > { %v601_v19 = vpop.f32.mrf.mxu3 }
 0x154   : > { %v602_v28 = vadd.f32 %v601_v19, %v572_v27  ;;  %v641_v36 = vpop.f32.mrf.mxu0  ;;  %v686_v42 = vmul.f32 0.06666667, %v682_v35 }
 0x156   : > { %v675_v21 = vmul.f32 %v602_v28, %v602_v28  ;;  %v690_v47 = vmax.f32 %v686_v42, 1e-06 }
 0x157   : > { %v670_v37 = vpop.f32.mrf.mxu1 }
 0x158   : > { %v679_v24 = vmul.f32 0.0625, %v675_v21  ;;  %v575_v26 = vpop.f32.mrf.mxu2  ;;  %v671_v41 = vadd.f32 %v670_v37, %v641_v36  ;;  %v694_v53 = vmin.f32 %v690_v47, 1000000.0  ;;  %v978_v21 = vld [vmem:[%s1550_s4 + $0x6] sm:$0x3] }
 0x15a   : > { %v683_v29 = vsub.f32 %v668_v23, %v679_v24 }
 0x15b   : > { %v604_v31 = vpop.f32.mrf.mxu3 }
 0x15c   : > { %v687_v32 = vmul.f32 0.06666667, %v683_v29  ;;  %v605_v33 = vadd.f32 %v604_v31, %v575_v26 }
 0x15e   : > { %v676_v60 = vmul.f32 %v605_v33, %v605_v33  ;;  %v691_v40 = vmax.f32 %v687_v32, 1e-06 }
 0x160   : > { %v680_v39 = vmul.f32 0.0625, %v676_v60  ;;  %v695_v45 = vmin.f32 %v691_v40, 1000000.0 }
 0x162   : > { %v684_v43 = vsub.f32 %v671_v41, %v680_v39  ;;  %1092 = vlog2.f32 %v695_v45 }
 0x164   : > { %v688_v46 = vmul.f32 0.06666667, %v684_v43 }
 0x166   : > { %v692_v48 = vmax.f32 %v688_v46, 1e-06 }
 0x168   : > { %v696_v52 = vmin.f32 %v692_v48, 1000000.0  ;;  %v1093_v6 = vpop.eup %1092 }
 0x169   : > { %v702_v56 = vmul.f32 0.6931472, %v1093_v6 }
 0x16a   : > { %1094 = vlog2.f32 %v696_v52 }
 0x16b   : > { %1096 = vlog2.f32 %v694_v53 }
 0x16c   : > { %1098 = vlog2.f32 %v693_v54 }
 0x170   : > { %v1095_v55 = vpop.eup %1094 }
 0x171   : > { %v704_v57 = vmul.f32 0.6931472, %v1095_v55  ;;  %v1097_v58 = vpop.eup %1096 }
 0x172   : > { %v1099_v62 = vpop.eup %1098  ;;  %v700_v7 = vmul.f32 0.6931472, %v1097_v58 }
 0x173   : > { %762 = vmatpush.msrb.mxu3 %v704_v57  ;;  %v1045_v61 = vpack.i.bf16 %v702_v56, %v704_v57  ;;  %v698_v63 = vmul.f32 0.6931472, %v1099_v62 }
 0x175   : > { %1046 = vrot.lane.b32.xlu1 %v1045_v61, %s1169_s19  ;;  %1041 = vrot.lane.b32.xlu0 %v1045_v61, %s1170_s20  ;;  %v1055_v0 = vpack.i.bf16 %v698_v63, %v700_v7 }
 0x176   : > { %1031 = vrot.lane.b32.xlu2 %v1045_v61, %s1171_s26  ;;  %763 = vmatpush.msrb.mxu3 %v702_v56 }
 0x178   : > { %764 = vmatpush.msrb.mxu3 %v700_v7 }
 0x17a   : > { %765 = vmatpush.msrb.mxu3 %v698_v63 }
 0x17b   : > { %975 = vmatmul.msk.f32.vlgmr.msrb.gmra.mxu3 %vm286_vm0, %v705_v1 }
 0x17d   : > { %849 = vperm.xlu1 %1029, %v846_v50   ;;  %1056 = vrot.lane.b32.xlu0 %v1055_v0, %s1169_s19  ;;  %s981_s19 = sshll.u32 %s1228_s25, 1 }
 0x17e   : > { %1036 = vrot.lane.b32.xlu2 %v1055_v0, %s1171_s26  ;;  %s886_s28 = scalar_lea.hbm %s1552_s6, %s981_s19 }
 0x17f   : > { %s890_s10 = sshll.u32 %s886_s28, 4  ;;  %s891_s10 = int_to_ptr.hbm [resolvable:$true] %s890_s10 }
 0x180   : > { %s1118_s12 = sshra.s32 %s891_s10, 4  ;;  %s1119_s12 = int_to_ptr.hbm [resolvable:$true] %s1118_s12 }
 0x181   : > { %s1120_s13 = scalar_lea.hbm %s1119_s12, 2  ;;  %p1125_p0 = scmp.lt.s32.totalorder %s1119_s12, %s1552_s6 }
 0x182   : > { %p1121_p11 = scmp.ne.s32.totalorder %s1119_s12, %s1120_s13  ;;  %p1126_p1 = scmp.lt.s32.totalorder %s1124_s15, %s1120_s13 }
 0x184   : > { %p1122_p12 = pnand %p1121_p11, %p1245_p5  ;;  %p1127_p2 = por %p1126_p1, %p1125_p0 }
 0x186   : > { %1051 = vrot.lane.b32.xlu2 %v1055_v0, %s1170_s20  ;;  %p1123_p13 = pneg %p1122_p12 }
 0x188   : > { %p1128_p3 = pnand %p1127_p2, %p1123_p13 }
 0x1d0   : > { %v1032_v2 = vpop.permute.xlu2 %1031 }
 0x1d1   : > { %v1033_v51 = vunpack.i.l.bf16 %v1032_v2  ;;  %v1034_v3 = vunpack.i.h.bf16 %v1032_v2 }
 0x1d3   : > { %739 = vmatpush.msrb.mxu2 %v1033_v51 }
 0x1d5   : > { %740 = vmatpush.msrb.mxu2 %v1034_v3 }
 0x1d8   : > { %v1037_v4 = vpop.permute.xlu2 %1036 }
 0x1d9   : > { %v1038_v5 = vunpack.i.l.bf16 %v1037_v4  ;;  %v1039_v8 = vunpack.i.h.bf16 %v1037_v4 }
 0x1db   : > { %741 = vmatpush.msrb.mxu2 %v1038_v5 }
 0x1dd   : > { %742 = vmatpush.msrb.mxu2 %v1039_v8 }
 0x1de   : > { %974 = vmatmul.msk.f32.vlgmr.msrb.gmra.mxu2 %vm286_vm0, %v973_v9 }
 0x1e0   : > { %v1052_v14 = vpop.permute.xlu2 %1051 }
 0x1e1   : > { %v1053_v16 = vunpack.i.l.bf16 %v1052_v14  ;;  %v1054_v17 = vunpack.i.h.bf16 %v1052_v14 }
 0x1e7   : > { %v1047_v10 = vpop.permute.xlu1 %1046  ;;  %v1042_v11 = vpop.permute.xlu0 %1041 }
 0x1e8   : > { %v1048_v12 = vunpack.i.l.bf16 %v1047_v10  ;;  %v1043_v13 = vunpack.i.l.bf16 %v1042_v11  ;;  %v1049_v27 = vunpack.i.h.bf16 %v1047_v10  ;;  %v1044_v15 = vunpack.i.h.bf16 %v1042_v11 }
 0x1ea   : > { %799 = vmatpush.msra.mxu0 %v1043_v13  ;;  %837 = vmatpush.msra.mxu1 %v1048_v12 }
 0x1ec   : > { %800 = vmatpush.msra.mxu0 %v1044_v15  ;;  %838 = vmatpush.msra.mxu1 %v1049_v27 }
 0x1ee   : > { %801 = vmatpush.msra.mxu0 %v1053_v16 }
 0x1ef   : > { %v1057_v19 = vpop.permute.xlu0 %1056  ;;  %v850_v30 = vpop.permute.xlu1 %849 }
 0x1f0   : > { %v1058_v28 = vunpack.i.l.bf16 %v1057_v19  ;;  %802 = vmatpush.msra.mxu0 %v1054_v17  ;;  %v1059_v20 = vunpack.i.h.bf16 %v1057_v19 }
 0x1f1   : > { %977 = vmatmul.msk.f32.vlgmr.msra.gmra.mxu0 %vm286_vm0, %v976_v18 }
 0x1f2   : > { %839 = vmatpush.msra.mxu1 %v1058_v28 }
 0x1f4   : > { %840 = vmatpush.msra.mxu1 %v1059_v20 }
 0x1f5   : > { %979 = vmatmul.msk.f32.vlgmr.msra.gmra.mxu1 %vm286_vm0, %v978_v21 }
 0x1fe   : > { %v767_v23 = vpop.f32.mrf.mxu3 }
 0x261   : > { %v744_v22 = vpop.f32.mrf.mxu2 }
 0x262   : > { %v768_v24 = vadd.f32 %v767_v23, %v744_v22 }
 0x26e   : > { %v804_v25 = vpop.f32.mrf.mxu0 }
 0x26f   : > { %v807_v26 = vadd.f32 %v804_v25, %v768_v24 }
 0x272   : > { %v842_v29 = vpop.f32.mrf.mxu1 }
 0x273   : > { %v845_v59 = vadd.f32 %v842_v29, %v807_v26 }
 0x275   : > { %v852_v31 = vadd.f32 %v850_v30, %v845_v59 }
 0x277   : > { %v854_v32 = vsel %vm853_vm3, %v852_v31, -inf }
 0x278   : > { %v855_v33 = vrot.slane %v854_v32, 4 }
 0x27a   : > { %v856_v34 = vmax.f32 %v854_v32, %v855_v33 }
 0x27c   : > { %v857_v35 = vrot.slane %v856_v34, 2 }
 0x27e   : > { %v858_v36 = vmax.f32 %v856_v34, %v857_v35 }
 0x280   : > { %v859_v37 = vrot.slane %v858_v36, 1 }
 0x282   : > { %v860_v60 = vmax.f32 %v858_v36, %v859_v37 }
 0x284   : > { %v861_v38 = vsub.f32 %v852_v31, %v860_v60 }
 0x286   : > { %v862_v40 = vmul.f32 1.442695, %v861_v38 }
 0x288   : > { %1100 = vpow2.f32 %v862_v40 }
 0x28e   : > { %v1101_v41 = vpop.eup %1100 }
 0x28f   : > { %v864_v39 = vsel %vm853_vm3, %v1101_v41, 0.0 }
 0x290   : > { %v865_v42 = vrot.slane %v864_v39, 4 }
 0x292   : > { %v866_v43 = vadd.f32 %v865_v42, %v864_v39 }
 0x294   : > { %v867_v44 = vrot.slane %v866_v43, 2 }
 0x296   : > { %v868_v45 = vadd.f32 %v867_v44, %v866_v43 }
 0x298   : > { %v869_v46 = vrot.slane %v868_v45, 1 }
 0x29a   : > { %v870_v47 = vadd.f32 %v869_v46, %v868_v45 }
 0x29c   : > { %1102 = vlog2.f32 %v870_v47 }
 0x2a2   : > { %v1103_v48 = vpop.eup %1102 }
 0x2a3   : > { %v872_v49 = vmul.f32 0.6931472, %v1103_v48 }
 0x2a5   : > { %v873_v52 = vsub.f32 %v861_v38, %v872_v49 }
 0x2a7   : > { %874 = vst.msk [vmem:[%s244_s29] sm:$0x3] %vm853_vm3, %v873_v52 }
 0x2a8   : > { %1131 = shalt.err (!%p1128_p3)
}
 0x2a9   : > { %985 = dma.vmem_to_hbm [thread:$0]  (%p1245_p5), %s889_s9, 32, %s891_s10, %s876_s11  }
 0x2aa PF: > { %p991_p4 = scmp.ge.s32.totalorder %s1166_s24, 2  ;;  %s902_s17 = sand.u32 1, %s1154_s21  }
 0x2ab   : > { %s903_s19 = scalar_lea.sflag [#allocation3], %s902_s17 }
 0x2ac   : > { %p988_p7 = pnand %p991_p4, %p1249_p6 }
 0x2ae   : > { %p989_p8 = pneg %p988_p7 }
 0x2b0   : > { %1149 = dma.done.wait (%p989_p8), %s903_s19, 32  }
 0x2b1   : > { %1151 = vsyncadd (%p989_p8), %s903_s19, 4294967264  ;;  %p16_p9 = scmp.ge.s32.totalorder %s1232_s27, 4   ;;  %s1563_s21 = smov %s1158_s22 }
 0x2b2   : > { %s1564_s22 = smov %s1162_s23  ;;  %s1565_s23 = smov %s1243_s30 }
 0x2b3   : > { %s1566_s24 = smov %s1232_s27  ;;  %18 = sbr.rel (!%p16_p9) target bundleno = 3 (0x3), region = 82 }
 0x2b8   :  { %909 = vsyncpa [#allocation3], 1 }
 0x2b9   :  { %911 = vsyncpa [#allocation3 + $0x1], 1 }

</bundles_post_ra>
